<compile_context>
chip_gen: v7x
topology: tpu7x:2x2x1
jax: 0.10.0
libtpu: 0.0.40
codegen_flags: <defaults>
</compile_context>

<pallas_src>
import math
import functools

import jax
import jax.numpy as jnp
from jax.experimental import pallas as pl
from jax.experimental.pallas import tpu as pltpu


def _round_up(x, m):
    return ((x + m - 1) // m) * m


def _pick_tile(dim_padded, cap, align):
    """Largest multiple of `align` that is <= cap and exactly divides
    `dim_padded` (itself a multiple of `align`).  Tiles never overshoot the
    padded extent, so non-friendly shapes don't pay extra flops/DMA."""
    if dim_padded <= cap:
        return dim_padded
    t = (cap // align) * align
    while t > align:
        if dim_padded % t == 0:
            return t
        t -= align
    return align


# ------------------------------ kernels ------------------------------------


def _kernel_single_k(x_ref, w_ref, b_ref, o_ref):
    # Whole K fits in one tile: no accumulator state, no init/epilogue.
    acc = jnp.dot(x_ref[...].astype(w_ref.dtype), w_ref[...],
                  preferred_element_type=jnp.float32)
    o_ref[...] = (acc + b_ref[...].astype(jnp.float32)).astype(o_ref.dtype)


def _kernel_multi_k_f32out(x_ref, w_ref, b_ref, o_ref):
    # f32 output: o_ref is resident across the k axis (index_map is (i, j)),
    # so accumulate straight into it -- no scratch, no epilogue copy.
    k = pl.program_id(2)
    part = jnp.dot(x_ref[...].astype(w_ref.dtype), w_ref[...],
                   preferred_element_type=jnp.float32)

    @pl.when(k == 0)
    def _():
        o_ref[...] = part + b_ref[...].astype(jnp.float32)

    @pl.when(k > 0)
    def _():
        o_ref[...] += part


def _kernel_multi_k_scratch(x_ref, w_ref, b_ref, o_ref, acc_ref):
    # Narrow output dtype: keep a f32 VMEM accumulator, cast once at the end.
    k = pl.program_id(2)
    part = jnp.dot(x_ref[...].astype(w_ref.dtype), w_ref[...],
                   preferred_element_type=jnp.float32)

    @pl.when(k == 0)
    def _():
        acc_ref[...] = part + b_ref[...].astype(jnp.float32)

    @pl.when(k > 0)
    def _():
        acc_ref[...] += part

    @pl.when(k == pl.num_programs(2) - 1)
    def _():
        o_ref[...] = acc_ref[...].astype(o_ref.dtype)


# ------------------------------ wrappers ------------------------------------


def prepare_linear_params(weight, bias=None, compute_dtype=jnp.bfloat16):
    """One-time (init-time) layout prep -- keep OFF the jitted hot path.

    weight: [N, K] (torch nn.Linear layout), bias: [N] or None.
    Returns:
      w_t: [Kp, Np] in `compute_dtype`, K/N zero-padded to multiples of 128
           and pre-transposed so the kernel runs the canonical (M,K)x(K,N)
           MXU contraction.
      b2d: [1, Np] float32 bias row (zeros if bias is None).
    """
    weight = jnp.asarray(weight)
    n, k = weight.shape
    kp, np_ = _round_up(k, 128), _round_up(n, 128)
    w_t = jnp.pad(weight, ((0, np_ - n), (0, kp - k))).T.astype(compute_dtype)
    if bias is None:
        b = jnp.zeros((n,), jnp.float32)
    else:
        b = jnp.asarray(bias, jnp.float32)
    b2d = jnp.pad(b.reshape(1, n), ((0, 0), (0, np_ - n)))
    return w_t, b2d


@functools.partial(jax.jit,
                   static_argnames=("n_out", "tm_cap", "tn_cap", "tk_cap"))
def linear_pallas(x, w_t, b2d, *, n_out, tm_cap=512, tn_cap=1024, tk_cap=512):
    """y = x @ W^T + b with prepared params (see prepare_linear_params).

    x: [..., K];  w_t: [Kp, Np] (pre-transposed, pre-padded, compute dtype);
    b2d: [1, Np] f32;  n_out: logical output features.
    """
    lead = x.shape[:-1]
    K = x.shape[-1]
    Kp, Np = w_t.shape
    assert Kp == _round_up(K, 128), "prepared weight does not match x's K"
    assert n_out <= Np

    x2d = x.reshape(-1, K)
    M = x2d.shape[0]
    out_dtype = x.dtype
    out_is_f32 = jnp.dtype(out_dtype) == jnp.dtype(jnp.float32)

    # --- K must be exactly zero-padded (it is the contraction dim). --------
    # TODO(synk): a non-128-aligned K still pads x on the hot path; keep K
    # aligned upstream (real models usually are) to avoid this extra pass.
    if Kp != K:
        x2d = jnp.pad(x2d, ((0, 0), (0, Kp - K)))

    # --- Tile selection: hardware-aligned, dividing the padded extents. ----
    x_item = jnp.dtype(x2d.dtype).itemsize
    sub = {2: 16, 1: 32}.get(x_item, 8)          # native sublane multiple
    tm = _round_up(min(tm_cap, _round_up(M, sub)), sub)
    tn = _pick_tile(Np, tn_cap, 128)             # divides Np -> lane-dense
    tk = _pick_tile(Kp, tk_cap, 128)             # divides Kp -> exact K sum

    grid_m = pl.cdiv(M, tm)                      # M edge handled by masking
    grid_n = Np // tn
    grid_k = Kp // tk

    # v7x shards the "parallel" grid axes over 2 TensorCores: make sure there
    # are at least two (m, n) blocks so both cores get work.
    if grid_m * grid_n < 2:
        if tn > 128:
            tn = _pick_tile(Np, max(128, tn // 2), 128)
            grid_n = Np // tn
        elif tm > sub:
            tm = _round_up(tm // 2, sub)
            grid_m = pl.cdiv(M, tm)

    # --- VMEM budget: double-buffered blocks (+ optional f32 scratch). -----
    w_item = jnp.dtype(w_t.dtype).itemsize
    o_item = jnp.dtype(out_dtype).itemsize
    use_scratch = (grid_k > 1) and not out_is_f32
    vmem_est = (2 * tm * tk * x_item          # x blocks
                + 2 * tk * tn * w_item        # weight blocks
                + 2 * tn * 4                  # bias blocks
                + 2 * tm * tn * o_item        # output blocks
                + (tm * tn * 4 if use_scratch else 0))
    vmem_limit = int(min(48 << 20, max(2 * vmem_est + (2 << 20), 8 << 20)))

    if grid_k == 1:
        grid = (grid_m, grid_n)
        kernel = _kernel_single_k
        in_specs = [
            pl.BlockSpec((tm, tk), lambda i, j: (i, 0)),   # x
            pl.BlockSpec((tk, tn), lambda i, j: (0, j)),   # W^T  (Kp, Np)
            pl.BlockSpec((1, tn), lambda i, j: (0, j)),    # bias
        ]
        out_specs = pl.BlockSpec((tm, tn), lambda i, j: (i, j))
        scratch_shapes = []
        dim_sem = ("parallel", "parallel")
    else:
        grid = (grid_m, grid_n, grid_k)
        kernel = _kernel_multi_k_f32out if out_is_f32 else _kernel_multi_k_scratch
        in_specs = [
            pl.BlockSpec((tm, tk), lambda i, j, k: (i, k)),
            pl.BlockSpec((tk, tn), lambda i, j, k: (k, j)),
            pl.BlockSpec((1, tn), lambda i, j, k: (0, j)),
        ]
        out_specs = pl.BlockSpec((tm, tn), lambda i, j, k: (i, j))
        scratch_shapes = ([] if out_is_f32
                          else [pltpu.VMEM((tm, tn), jnp.float32)])
        dim_sem = ("parallel", "parallel", "arbitrary")

    out = pl.pallas_call(
        kernel,
        out_shape=jax.ShapeDtypeStruct((M, Np), out_dtype),
        grid_spec=pltpu.PrefetchScalarGridSpec(
            num_scalar_prefetch=0,
            grid=grid,
            in_specs=in_specs,
            out_specs=out_specs,
            scratch_shapes=scratch_shapes,
        ),
        compiler_params=pltpu.CompilerParams(
            dimension_semantics=dim_sem,
            vmem_limit_bytes=vmem_limit,
        ),
    )(x2d, w_t, b2d)

    if Np != n_out:               # only when N is not 128-aligned (cheap)
        out = out[:, :n_out]
    return out.reshape(*lead, n_out)


def my_linear_forward(x, weight, bias=None, compute_dtype=jnp.bfloat16):
    """Convenience one-shot call mirroring MyLinear.forward (in production,
    call prepare_linear_params once at init and reuse its outputs)."""
    w_t, b2d = prepare_linear_params(weight, bias, compute_dtype)
    return linear_pallas(x, w_t, b2d, n_out=weight.shape[0])


def init_mylinear_params(key, in_features, out_features, dtype=jnp.float32):
    """Deterministic emulation of MyLinear.reset_parameters()."""
    kw, kb = jax.random.split(key)
    # kaiming_uniform_(a=sqrt(5)) on (out, in): bound = sqrt(6/((1+a^2)*fan_in))
    fan_in = in_features
    w_bound = math.sqrt(6.0 / ((1.0 + 5.0) * fan_in))
    weight = jax.random.uniform(
        kw, (out_features, in_features), dtype, minval=-w_bound, maxval=w_bound
    )
    b_bound = 1.0 / math.sqrt(fan_in) if fan_in > 0 else 0.0
    bias = jax.random.uniform(
        kb, (out_features,), dtype, minval=-b_bound, maxval=b_bound
    )
    return weight, bias


if __name__ == "__main__":
    key = jax.random.PRNGKey(0)
    k_x, k_p, k_x2, k_p2, k_x3, k_p3 = jax.random.split(key, 6)

    # --- Check 1: shapes mirroring the test module (single-K fast kernel). --
    batch, seq, in_features, out_features = 2, 8, 32, 32
    x = jax.random.normal(k_x, (batch, seq, in_features), jnp.float32)
    weight, bias = init_mylinear_params(k_p, in_features, out_features)
    w_t, b2d = prepare_linear_params(weight, bias)          # init-time prep

    y = jax.block_until_ready(linear_pallas(x, w_t, b2d, n_out=out_features))
    y_ref = x @ weight.T + bias
    assert y.shape == (batch, seq, out_features)
    assert jnp.allclose(y, y_ref, atol=2e-2, rtol=2e-2)     # bf16 operands

    # --- Check 2: forces the multi-K accumulator path and a 3-D grid. -------
    M2, K2, N2 = 256, 384, 256
    x2 = jax.random.normal(k_x2, (M2, K2), jnp.float32)
    w2, b2 = init_mylinear_params(k_p2, K2, N2)
    w2_t, b2_2d = prepare_linear_params(w2, b2)
    y2 = jax.block_until_ready(
        linear_pallas(x2, w2_t, b2_2d, n_out=N2, tk_cap=256)  # -> grid_k = 3
    )
    y2_ref = x2 @ w2.T + b2
    assert y2.shape == (M2, N2)
    assert jnp.allclose(y2, y2_ref, atol=2e-2, rtol=2e-2)

    # --- Check 3: awkward shapes (M, K, N all misaligned) -> edge masking. --
    M3, K3, N3 = 100, 200, 160
    x3 = jax.random.normal(k_x3, (M3, K3), jnp.float32)
    w3, b3 = init_mylinear_params(k_p3, K3, N3)
    w3_t, b3_2d = prepare_linear_params(w3, b3)
    y3 = jax.block_until_ready(linear_pallas(x3, w3_t, b3_2d, n_out=N3))
    y3_ref = x3 @ w3.T + b3
    assert y3.shape == (M3, N3)
    assert jnp.allclose(y3, y3_ref, atol=2e-2, rtol=2e-2)

    print("KERNEL_OK")
</pallas_src>

<mosaic_0001>
module attributes {stable_mosaic.version = 11 : i64} {
  func.func @_kernel_single_k(%arg0: i32, %arg1: i32, %arg2: memref<8x128xf32, #tpu.memory_space<vmem>>, %arg3: memref<128x128xbf16, #tpu.memory_space<vmem>>, %arg4: memref<1x128xf32, #tpu.memory_space<vmem>>, %arg5: memref<8x128xf32, #tpu.memory_space<vmem>>) attributes {dimension_semantics = [#tpu.dimension_semantics<parallel>, #tpu.dimension_semantics<parallel>], iteration_bounds = array<i64: 2, 1>, scalar_prefetch = 0 : i64, scratch_operands = 0 : i64, tpu.core_type = #tpu.core_type<tc>, window_params = [{transform_indices = @transform_0, window_bounds = array<i64: 8, 128>}, {transform_indices = @transform_1, window_bounds = array<i64: 128, 128>}, {transform_indices = @transform_2, window_bounds = array<i64: 1, 128>}, {transform_indices = @transform_3, window_bounds = array<i64: 8, 128>}]} {
    %c0 = arith.constant 0 : index
    %c0_0 = arith.constant 0 : index
    %0 = vector.load %arg2[%c0, %c0_0] : memref<8x128xf32, #tpu.memory_space<vmem>>, vector<8x128xf32>
    %1 = arith.truncf %0 : vector<8x128xf32> to vector<8x128xbf16>
    %c0_1 = arith.constant 0 : index
    %c0_2 = arith.constant 0 : index
    %2 = vector.load %arg3[%c0_1, %c0_2] : memref<128x128xbf16, #tpu.memory_space<vmem>>, vector<128x128xbf16>
    %cst = arith.constant dense<0.000000e+00> : vector<8x128xf32>
    %3 = tpu.matmul %1, %2, %cst {dimension_numbers = #tpu.dot_dimension_numbers<[1], [0], [0], [1], [0, 0, 1, 1], [], []>} : vector<8x128xbf16>, vector<128x128xbf16>, vector<8x128xf32> -> vector<8x128xf32>
    %c0_3 = arith.constant 0 : index
    %c0_4 = arith.constant 0 : index
    %4 = vector.load %arg4[%c0_3, %c0_4] : memref<1x128xf32, #tpu.memory_space<vmem>>, vector<1x128xf32>
    %5 = vector.broadcast %4 : vector<1x128xf32> to vector<8x128xf32>
    %6 = arith.addf %3, %5 : vector<8x128xf32>
    %c0_5 = arith.constant 0 : index
    %c0_6 = arith.constant 0 : index
    %7 = vector.load %arg5[%c0_5, %c0_6] : memref<8x128xf32, #tpu.memory_space<vmem>>, vector<8x128xf32>
    tpu.vector_store %arg5[%c0_5, %c0_6], %6 {strides = array<i32>} : memref<8x128xf32, #tpu.memory_space<vmem>>, vector<8x128xf32>,
    return
  }
  func.func @transform_0(%arg0: i32, %arg1: i32) -> (i32, i32) {
    %c0_i32 = arith.constant 0 : i32
    %c0_i32_0 = arith.constant 0 : i32
    return %arg0, %c0_i32 : i32, i32
  }
  func.func @transform_1(%arg0: i32, %arg1: i32) -> (i32, i32) {
    %c0_i32 = arith.constant 0 : i32
    %c0_i32_0 = arith.constant 0 : i32
    return %c0_i32, %arg1 : i32, i32
  }
  func.func @transform_2(%arg0: i32, %arg1: i32) -> (i32, i32) {
    %c0_i32 = arith.constant 0 : i32
    %c0_i32_0 = arith.constant 0 : i32
    return %c0_i32, %arg1 : i32, i32
  }
  func.func @transform_3(%arg0: i32, %arg1: i32) -> (i32, i32) {
    %c0_i32 = arith.constant 0 : i32
    return %arg0, %arg1 : i32, i32
  }
}

</mosaic_0001>

<bundles_post_ra>
// kernel: linear_pallas.1
= control target key start
LH: loop header
LB: loop body
LE: loop exit
PB: predicated region body
PF: predicated region fallthrough
CT: control target
= control target key end

     0   :  { %8 = vsyncpa [#allocation3], 0  ;;  %s613_s12 = smov 0   ;;  %s615_s13 = smov 0   ;;  %s692_s0 = inlined_call_operand.vmem [shape: f32[16,128], index: 0, kind: input, shape index: {}]   ;;  %s693_s1 = inlined_call_operand.hbm [shape: bf16[128,128], index: 1, kind: input, shape index: {}]   ;;  %s694_s2 = inlined_call_operand.vmem [shape: f32[1,128], index: 2, kind: input, shape index: {}]   ;;  %s695_s3 = inlined_call_operand.vmem [shape: f32[16,128], index: 3, kind: output, shape index: {}]  }
   0x1   :  { %s617_s14 = smov 0  }
   0x2 LB: > { %s435_s15 = sadd.s32 4294967295, %s586_s14   ;;  %s26_s16 = sadd.s32 1, %s582_s13  ;;  %s586_s14 = sphi %s617_s14, %s14_s14   ;;  %s582_s13 = sphi %s615_s13, %s705_s13   ;;  %s578_s12 = sphi %s613_s12, %s704_s12  }
   0x3   : > { %p28_p0 = scmp.ge.s32.totalorder %s26_s16, 2  ;;  %p437_p1 = scmp.ge.s32.totalorder %s586_s14, 1 }
   0x4   : > { %p137_p2 = scmp.lt.s32.totalorder %s586_s14, 3  ;;  %p638_p4 = scmp.eq.s32.totalorder %s435_s15, 0 }
   0x5   : > { %s707_s16 = smov (%p28_p0, %s26_s16), 0  ;;  %s588_s19 = smov [#allocation2]  }
   0x6   : > { %p634_p3 = pnand %p437_p1, %p137_p2  ;;  %s151_s20 = sshll.u32 %s588_s19, 4  ;;  %s152_s20 = int_to_ptr.vmem [resolvable:$true] %s151_s20 }
   0x7   : > { %s700_s18 = scalar_select %p638_p4, 1, 0 }
   0x8   : > { %s699_s17 = scalar_select %p634_p3, 1, 0 }
   0x9   : > { %p489_p5 = pneg %p634_p3  ;;  %s532_s24 = scalar_lea.hbm %s693_s1, 1024 }
   0xa   : > { %p533_p7 = scmp.ne.s32.totalorder %s693_s1, %s532_s24  ;;  %p539_p11 = scmp.lt.u32.totalorder %s532_s24, %s693_s1 }
   0xb   : > { %p646_p6 = pnand %p638_p4, %p489_p5 }
   0xd   : > { %p534_p8 = pneg %p646_p6 }
   0xf   : > { %p535_p9 = pnand %p534_p8, %p533_p7 }
  0x11   : > { %p536_p10 = pneg %p535_p9 }
  0x13   : > { %p541_p12 = pnand %p539_p11, %p536_p10 }
  0x15   : > { %544 = shalt.err (!%p541_p12)
}
  0x16   : > { %s545_s29 = scalar_lea.vmem %s152_s20, 1024  ;;  %p553_p2 = scmp.lt.s32.totalorder %s152_s20, %s152_s20 }
  0x17   : > { %p546_p13 = scmp.ne.s32.totalorder %s152_s20, %s545_s29  ;;  %p554_p5 = scmp.lt.s32.totalorder %s545_s29, %s545_s29 }
  0x19   : > { %p548_p0 = pnand %p546_p13, %p534_p8  ;;  %p555_p4 = por %p554_p5, %p553_p2 }
  0x1b   : > { %p549_p1 = pneg %p548_p0 }
  0x1d   : > { %p556_p3 = pnand %p555_p4, %p549_p1 }
  0x1f   : > { %559 = shalt.err (!%p556_p3)
}
  0x20   : > { %s589_s30 = smov 64   ;;  %s590_s4 = smov 4  }
  0x21   : > { %492 = dma.hbm_to_vmem [thread:$0]  (!%p646_p6), %s693_s1, 1024, %s152_s20, [#allocation3], %s589_s30, %s589_s30, %s590_s4  }
  0x22   : > { %p702_p7 = scmp.ne.s32.totalorder %s699_s17, 0 }
  0x23   : > { %p703_p9 = scmp.ne.s32.totalorder (!%p702_p7), %s700_s18, 0 }
  0x24   : > { %180 = sbr.rel (%p702_p7) target bundleno = 292 (0x124), region = 32 }
  0x2b   : > { %573 = dma.done.wait (%p703_p9), [#allocation3], 1024  }
  0x2c   : > { %575 = vsyncadd (%p703_p9), [#allocation3], 4294966272  ;;  %v591_v0 = vmov 0.0   ;;  %vm592_vm0 = vmmov 0   ;;  %v524_v1 = vld [vmem:[#allocation2] sm:$0xff]   ;;  %v525_v2 = vld [vmem:[#allocation2 + $0x8] sm:$0xff]  }
  0x2d   : > { %465 = vmatprep.subr.bf16.mxu0 %v591_v0  ;;  %481 = vmatprep.mubr.msk.bf16.mxu0 %vm592_vm0, %v591_v0  ;;  %v526_v3 = vld [vmem:[#allocation2 + $0x10] sm:$0xff]   ;;  %v527_v4 = vld [vmem:[#allocation2 + $0x18] sm:$0xff]   ;;  %p208_p3 = scmp.lt.s32.totalorder %s578_s12, 1  ;;  %v528_v5 = vld [vmem:[#allocation2 + $0x20] sm:$0xff]  }
  0x2e   : > { %466 = vmatpush3.bf16.msra.mxu0 %v524_v1  ;;  %v529_v6 = vld [vmem:[#allocation2 + $0x28] sm:$0xff]   ;;  %v530_v7 = vld [vmem:[#allocation2 + $0x30] sm:$0xff]   ;;  %v531_v8 = vld [vmem:[#allocation2 + $0x38] sm:$0xff]  }
  0x2f   : > { %467 = vmatprep.subr.bf16.mxu0 %v591_v0  ;;  %s709_s12 = smov (!%p208_p3, %s578_s12), 1  ;;  %v445_v11 = vld [vmem:[%s694_s2] ss:$0 sm:$0xff] }
  0x30   : > { %s443_s7 = sshll.u32 %s709_s12, 3 }
  0x31   : > { %s211_s10 = scalar_lea.vmem %s692_s0, %s443_s7  ;;  %s221_s18 = scalar_lea.vmem %s695_s3, %s443_s7 }
  0x32   : > { %468 = vmatpush3.bf16.msra.mxu0 %v525_v2  ;;  %v223_v9 = vld [vmem:[%s211_s10] sm:$0xff] }
  0x33   : > { %469 = vmatprep.subr.bf16.mxu0 %v591_v0  ;;  %v224_v10 = vpack.c.bf16 %v223_v9, %v223_v9 }
  0x36   : > { %470 = vmatpush3.bf16.msra.mxu0 %v526_v3 }
  0x37   : > { %471 = vmatprep.subr.bf16.mxu0 %v591_v0 }
  0x3a   : > { %472 = vmatpush3.bf16.msra.mxu0 %v527_v4 }
  0x3b   : > { %473 = vmatprep.subr.bf16.mxu0 %v591_v0 }
  0x3e   : > { %474 = vmatpush3.bf16.msra.mxu0 %v528_v5 }
  0x3f   : > { %475 = vmatprep.subr.bf16.mxu0 %v591_v0 }
  0x42   : > { %476 = vmatpush3.bf16.msra.mxu0 %v529_v6 }
  0x43   : > { %477 = vmatprep.subr.bf16.mxu0 %v591_v0 }
  0x46   : > { %478 = vmatpush3.bf16.msra.mxu0 %v530_v7 }
  0x47   : > { %479 = vmatprep.subr.bf16.mxu0 %v591_v0 }
  0x4a   : > { %480 = vmatpush3.bf16.msra.mxu0 %v531_v8 }
  0x4d   : > { %482 = vmatmul.mubr.bf16.vlgmr.msra.gmra.mrb[0].mxu0 %v224_v10 }
 0x120   : > { %v330_v12 = vpop.f32.mrb[0].mxu0 }
 0x121   : > { %v331_v13 = vadd.f32 %v445_v11, %v330_v12  ;;  %v483_v14 = vpop.f32.mrb[1].mxu0 }
 0x122   : > { %v333_v15 = vpop.f32.mrb[2].mxu0 }
 0x123   : > { %336 = vst [vmem:[%s221_s18] sm:$0xff] %v331_v13  ;;  %v484_v16 = vpop.f32.mrb[3].mxu0 }
 0x124 PF: > { %s14_s14 = sadd.s32 1, %s586_s14   ;;  %s704_s12 = smov %s582_s13 }
 0x125   : > { %p11_p4 = scmp.ge.s32.totalorder %s14_s14, 4   ;;  %s705_s13 = smov %s707_s16 }
 0x127   :  { %13 = sbr.rel (!%p11_p4) target bundleno = 2 (0x2), region = 71 }
 0x12e   :  { %362 = vsyncpa [#allocation3], 1 }
 0x12f   :  { %364 = vsyncpa [#allocation3 + $0x1], 1 }

</bundles_post_ra>
